<compile_context>
chip_gen: v5e
topology: v5e:2x2
jax: 0.10.0
libtpu: 0.0.40
codegen_flags: <defaults>
</compile_context>

<pallas_src>
import functools

import jax
import jax.numpy as jnp
from jax.experimental import pallas as pl
from jax.experimental.pallas import tpu as pltpu

LANE = 128


def _round_up(x: int, m: int) -> int:
    return ((x + m - 1) // m) * m


def logsignature_channels(path_dim: int, depth: int = 2) -> int:
    # number of Lyndon words of length <= depth over an alphabet of size path_dim
    assert depth == 2, "only logsig_level=2 supported in this synthetic kernel"
    return path_dim + path_dim * (path_dim - 1) // 2


# ----------------------------------------------------------------------------
# Pallas kernels
# ----------------------------------------------------------------------------
def fused_forward_kernel(t_ref, noise_ref, mean_ref, scale_ref,
                         w1_ref, b1_ref, w2_ref, b2_ref,
                         fake_t_ref, real_t_ref, loss_ref, *, neg_inv_b):
    """Sampling + MLP + empirical characteristic functions + loss, fully fused."""
    t = t_ref[0]

    # Reparameterized sampling.  mean/scale are zero/one padded over the first
    # `path_dim` columns and zero over the lane-padding columns, so this single
    # fused elementwise op reproduces concat([bm, mean + exp(.5*logvar)*eps]).
    x = mean_ref[...] + scale_ref[...] * noise_ref[...]                  # [B, Lp]

    # Linear -> Sigmoid -> Linear  (MXU matmuls, f32 accumulation)
    h = jax.nn.sigmoid(
        jnp.dot(x, w1_ref[...], preferred_element_type=jnp.float32) + b1_ref[...])
    coeff = jnp.dot(h, w2_ref[...],
                    preferred_element_type=jnp.float32) + b2_ref[...]   # [B, Lp]

    # Empirical characteristic functions E_x[exp(i * t * <u, x>)], real/imag
    # split into cos/sin (EUP) -- no complex dtype in the kernel.
    phase_f = t * jnp.dot(coeff, fake_t_ref[...],
                          preferred_element_type=jnp.float32)            # [B, Nf]
    phase_r = t * jnp.dot(coeff, real_t_ref[...],
                          preferred_element_type=jnp.float32)            # [B, Nr]
    re_f = jnp.mean(jnp.cos(phase_f), axis=-1, keepdims=True)            # [B, 1]
    im_f = jnp.mean(jnp.sin(phase_f), axis=-1, keepdims=True)
    re_r = jnp.mean(jnp.cos(phase_r), axis=-1, keepdims=True)
    im_r = jnp.mean(jnp.sin(phase_r), axis=-1, keepdims=True)

    dr = re_f - re_r
    di = im_f - im_r
    loss_ref[0, 0] = neg_inv_b * jnp.sum(dr * dr + di * di)


def mlp_kernel(noise_ref, mean_ref, scale_ref, w1_ref, b1_ref, w2_ref, b2_ref,
               out_ref):
    """Standalone sample_coefficients kernel (lane-dense [B, Lp] output)."""
    x = mean_ref[...] + scale_ref[...] * noise_ref[...]
    h = jax.nn.sigmoid(
        jnp.dot(x, w1_ref[...], preferred_element_type=jnp.float32) + b1_ref[...])
    y = jnp.dot(h, w2_ref[...], preferred_element_type=jnp.float32) + b2_ref[...]
    out_ref[...] = y.astype(out_ref.dtype)


def loss_kernel(re_f_ref, im_f_ref, re_r_ref, im_r_ref, out_ref, *, neg_inv_b):
    """Fallback loss reduction for generic (external) characteristic callables."""
    dr = re_f_ref[...] - re_r_ref[...]
    di = im_f_ref[...] - im_r_ref[...]
    out_ref[0, 0] = neg_inv_b * jnp.sum(dr * dr + di * di)


# ----------------------------------------------------------------------------
# Empirical characteristic function of a point cloud (fusable into the kernel).
# ----------------------------------------------------------------------------
class EmpiricalCharacteristic:
    """E_x[exp(i * t * <u, x>)] over a point cloud `data` of shape [N, L].

    Stores a lane-padded transposed copy once at construction so the fused
    kernel can consume it directly without per-call padding/transpose ops.
    """

    def __init__(self, data):
        data = jnp.asarray(data, jnp.float32)                    # [N, L]
        n, feat = data.shape
        feat_pad = _round_up(feat, LANE)
        self.data = data
        self.data_t_pad = jnp.zeros((feat_pad, n), jnp.float32).at[:feat, :].set(
            data.T)                                              # [Lp, N]

    def __call__(self, u, *args):
        # Supports both fake_characteristic(u, t) and real_characteristic(u, d, t)
        t = args[-1]
        phase = t * (u @ self.data.T)                            # [B, N]
        return jnp.mean(jnp.exp(1j * phase), axis=-1)            # [B] complex


# ----------------------------------------------------------------------------
# Module (parameters + wrappers around pallas_call)
# ----------------------------------------------------------------------------
class EmbeddedCharacteristicDiscriminator:
    def __init__(self, batch_size, path_dim, hidden_dim, logsig_level=2, *,
                 key=jax.random.PRNGKey(0)):
        self.batch_size = batch_size
        self.path_dim = path_dim
        self.hidden_dim = hidden_dim
        self.logsig_length = logsignature_channels(path_dim, logsig_level)
        L, H, d = self.logsig_length, hidden_dim, path_dim
        Lp = _round_up(L, LANE)
        self.lane_pad = Lp

        k = jax.random.split(key, 6)
        # levy_mean: torch.empty (uninitialized) -> deterministic small normal
        self.levy_mean = 0.01 * jax.random.normal(k[0], (1, L - d), jnp.float32)
        # levy_logvar: kaiming_normal_ -> std = sqrt(2 / fan_in)
        self.levy_logvar = jax.random.normal(k[1], (1, L - d), jnp.float32) * jnp.sqrt(
            2.0 / (L - d))
        # nn.Linear default init: U(-1/sqrt(in), 1/sqrt(in)); stored as [in, out]
        lim1 = 1.0 / jnp.sqrt(L)
        w1 = jax.random.uniform(k[2], (L, H), jnp.float32, -lim1, lim1)
        self.b1 = jax.random.uniform(k[3], (1, H), jnp.float32, -lim1, lim1)
        lim2 = 1.0 / jnp.sqrt(H)
        w2 = jax.random.uniform(k[4], (H, L), jnp.float32, -lim2, lim2)
        b2 = jax.random.uniform(k[5], (1, L), jnp.float32, -lim2, lim2)

        # --- precomputed, lane-padded kernel operands (built ONCE, not per call) ---
        # mean_full: zeros over the bm columns and the lane-padding columns.
        self.mean_full = jnp.zeros((1, Lp), jnp.float32).at[:, d:L].set(
            self.levy_mean)                                               # [1, Lp]
        # scale_full: 1 over bm columns (noise passes through), exp(0.5*logvar)
        # over levy columns, 0 over lane-padding columns (kills padded noise).
        self.scale_full = (jnp.zeros((1, Lp), jnp.float32)
                           .at[:, :d].set(1.0)
                           .at[:, d:L].set(jnp.exp(0.5 * self.levy_logvar)))  # [1, Lp]
        # Zero-padded weights: extra rows/cols are exact zeros -> identical math.
        self.w1_pad = jnp.zeros((Lp, H), jnp.float32).at[:L, :].set(w1)   # [Lp, H]
        self.w2_pad = jnp.zeros((H, Lp), jnp.float32).at[:, :L].set(w2)   # [H, Lp]
        self.b2_pad = jnp.zeros((1, Lp), jnp.float32).at[:, :L].set(b2)   # [1, Lp]

    # ---- sample_coefficients: single Pallas MLP kernel (lane-dense output) ----
    def sample_coefficients(self, key):
        B, L, Lp = self.batch_size, self.logsig_length, self.lane_pad
        noise = jax.random.normal(key, (B, Lp), jnp.float32)
        vspec = pl.BlockSpec(memory_space=pltpu.VMEM)
        coeff_pad = pl.pallas_call(
            mlp_kernel,
            out_shape=jax.ShapeDtypeStruct((B, Lp), jnp.float32),
            in_specs=[vspec] * 7,
            out_specs=vspec,
        )(noise, self.mean_full, self.scale_full, self.w1_pad, self.b1,
          self.w2_pad, self.b2_pad)
        return coeff_pad[:, :L]

    # ---- forward: fully fused Pallas kernel when the characteristic fns are
    #      empirical point-cloud characteristics; JAX-glue fallback otherwise ----
    def forward(self, fake_characteristic, real_characteristic, t=0.1, *,
                key=jax.random.PRNGKey(1)):
        B, Lp = self.batch_size, self.lane_pad

        fusable = (
            getattr(fake_characteristic, "data_t_pad", None) is not None
            and getattr(real_characteristic, "data_t_pad", None) is not None
            and fake_characteristic.data_t_pad.shape[0] == Lp
            and real_characteristic.data_t_pad.shape[0] == Lp)

        if fusable:
            noise = jax.random.normal(key, (B, Lp), jnp.float32)
            t_arr = jnp.full((1,), t, jnp.float32)
            vspec = pl.BlockSpec(memory_space=pltpu.VMEM)
            sspec = pl.BlockSpec(memory_space=pltpu.SMEM)
            d_loss = pl.pallas_call(
                functools.partial(fused_forward_kernel,
                                  neg_inv_b=-1.0 / self.batch_size),
                out_shape=jax.ShapeDtypeStruct((1, 1), jnp.float32),
                in_specs=[sspec] + [vspec] * 9,
                out_specs=sspec,
            )(t_arr, noise, self.mean_full, self.scale_full,
              self.w1_pad, self.b1, self.w2_pad, self.b2_pad,
              fake_characteristic.data_t_pad,
              real_characteristic.data_t_pad)[0, 0]
            # TODO(synk): PyTorch returns `self.logvar`, which is undefined in the
            # original module (bug); returning levy_logvar as the obvious intent.
            return d_loss, self.levy_logvar

        # Fallback: arbitrary external characteristic callables (complex-valued).
        coefficients = self.sample_coefficients(key)
        char_fake = fake_characteristic(coefficients, t)
        char_real = real_characteristic(coefficients, self.path_dim, t)
        re_f = jnp.real(char_fake).reshape(1, -1).astype(jnp.float32)
        im_f = jnp.imag(char_fake).reshape(1, -1).astype(jnp.float32)
        re_r = jnp.real(char_real).reshape(1, -1).astype(jnp.float32)
        im_r = jnp.imag(char_real).reshape(1, -1).astype(jnp.float32)
        vspec = pl.BlockSpec(memory_space=pltpu.VMEM)
        d_loss = pl.pallas_call(
            functools.partial(loss_kernel, neg_inv_b=-1.0 / self.batch_size),
            out_shape=jax.ShapeDtypeStruct((1, 1), jnp.float32),
            in_specs=[vspec] * 4,
            out_specs=pl.BlockSpec(memory_space=pltpu.SMEM),
        )(re_f, im_f, re_r, im_r)[0, 0]
        return d_loss, self.levy_logvar


if __name__ == "__main__":
    batch_size, path_dim, hidden_dim = 8, 4, 32
    L = logsignature_channels(path_dim, 2)             # 10

    disc = EmbeddedCharacteristicDiscriminator(
        batch_size, path_dim, hidden_dim, key=jax.random.PRNGKey(0))

    kf, kr = jax.random.split(jax.random.PRNGKey(2))
    fake_char = EmpiricalCharacteristic(
        jax.random.normal(kf, (16, L), jnp.float32))
    real_char = EmpiricalCharacteristic(
        jax.random.normal(kr, (16, L), jnp.float32) + 0.5)

    # Fused single-kernel forward path.
    d_loss, logvar = disc.forward(fake_char, real_char, t=0.1,
                                  key=jax.random.PRNGKey(1))
    # Standalone coefficient sampler (lane-dense MLP kernel).
    coeff = disc.sample_coefficients(jax.random.PRNGKey(3))

    jax.block_until_ready((d_loss, logvar, coeff))
    print("KERNEL_OK")
</pallas_src>

<mosaic_0001>
module attributes {stable_mosaic.version = 11 : i64} {
  func.func @fused_forward_kernel(%arg0: memref<1xf32, #tpu.memory_space<smem>>, %arg1: memref<8x128xf32, #tpu.memory_space<vmem>>, %arg2: memref<1x128xf32, #tpu.memory_space<vmem>>, %arg3: memref<1x128xf32, #tpu.memory_space<vmem>>, %arg4: memref<128x32xf32, #tpu.memory_space<vmem>>, %arg5: memref<1x32xf32, #tpu.memory_space<vmem>>, %arg6: memref<32x128xf32, #tpu.memory_space<vmem>>, %arg7: memref<1x128xf32, #tpu.memory_space<vmem>>, %arg8: memref<128x16xf32, #tpu.memory_space<vmem>>, %arg9: memref<128x16xf32, #tpu.memory_space<vmem>>, %arg10: memref<1x1xf32, #tpu.memory_space<smem>>) attributes {dimension_semantics = [], scalar_prefetch = 0 : i64, scratch_operands = 0 : i64, tpu.core_type = #tpu.core_type<tc>} {
    %c0 = arith.constant 0 : index
    %0 = memref.load %arg0[%c0] : memref<1xf32, #tpu.memory_space<smem>>
    %c0_0 = arith.constant 0 : index
    %c0_1 = arith.constant 0 : index
    %1 = vector.load %arg2[%c0_0, %c0_1] : memref<1x128xf32, #tpu.memory_space<vmem>>, vector<1x128xf32>
    %c0_2 = arith.constant 0 : index
    %c0_3 = arith.constant 0 : index
    %2 = vector.load %arg3[%c0_2, %c0_3] : memref<1x128xf32, #tpu.memory_space<vmem>>, vector<1x128xf32>
    %c0_4 = arith.constant 0 : index
    %c0_5 = arith.constant 0 : index
    %3 = vector.load %arg1[%c0_4, %c0_5] : memref<8x128xf32, #tpu.memory_space<vmem>>, vector<8x128xf32>
    %4 = vector.broadcast %2 : vector<1x128xf32> to vector<8x128xf32>
    %5 = arith.mulf %4, %3 : vector<8x128xf32>
    %6 = vector.broadcast %1 : vector<1x128xf32> to vector<8x128xf32>
    %7 = arith.addf %6, %5 : vector<8x128xf32>
    %c0_6 = arith.constant 0 : index
    %c0_7 = arith.constant 0 : index
    %8 = vector.load %arg4[%c0_6, %c0_7] : memref<128x32xf32, #tpu.memory_space<vmem>>, vector<128x32xf32>
    %cst = arith.constant dense<0.000000e+00> : vector<8x32xf32>
    %9 = tpu.matmul %7, %8, %cst {dimension_numbers = #tpu.dot_dimension_numbers<[1], [0], [0], [1], [0, 0, 1, 1], [], []>} : vector<8x128xf32>, vector<128x32xf32>, vector<8x32xf32> -> vector<8x32xf32>
    %c0_8 = arith.constant 0 : index
    %c0_9 = arith.constant 0 : index
    %10 = vector.load %arg5[%c0_8, %c0_9] : memref<1x32xf32, #tpu.memory_space<vmem>>, vector<1x32xf32>
    %11 = vector.broadcast %10 : vector<1x32xf32> to vector<8x32xf32>
    %12 = arith.addf %9, %11 : vector<8x32xf32>
    %13 = arith.negf %12 : vector<8x32xf32>
    %14 = math.exp %13 : vector<8x32xf32>
    %cst_10 = arith.constant 1.000000e+00 : f32
    %15 = vector.broadcast %cst_10 : f32 to vector<8x32xf32>
    %16 = arith.addf %15, %14 : vector<8x32xf32>
    %17 = arith.divf %15, %16 : vector<8x32xf32>
    %c0_11 = arith.constant 0 : index
    %c0_12 = arith.constant 0 : index
    %18 = vector.load %arg6[%c0_11, %c0_12] : memref<32x128xf32, #tpu.memory_space<vmem>>, vector<32x128xf32>
    %cst_13 = arith.constant dense<0.000000e+00> : vector<8x128xf32>
    %19 = tpu.matmul %17, %18, %cst_13 {dimension_numbers = #tpu.dot_dimension_numbers<[1], [0], [0], [1], [0, 0, 1, 1], [], []>} : vector<8x32xf32>, vector<32x128xf32>, vector<8x128xf32> -> vector<8x128xf32>
    %c0_14 = arith.constant 0 : index
    %c0_15 = arith.constant 0 : index
    %20 = vector.load %arg7[%c0_14, %c0_15] : memref<1x128xf32, #tpu.memory_space<vmem>>, vector<1x128xf32>
    %21 = vector.broadcast %20 : vector<1x128xf32> to vector<8x128xf32>
    %22 = arith.addf %19, %21 : vector<8x128xf32>
    %c0_16 = arith.constant 0 : index
    %c0_17 = arith.constant 0 : index
    %23 = vector.load %arg8[%c0_16, %c0_17] : memref<128x16xf32, #tpu.memory_space<vmem>>, vector<128x16xf32>
    %cst_18 = arith.constant dense<0.000000e+00> : vector<8x16xf32>
    %24 = tpu.matmul %22, %23, %cst_18 {dimension_numbers = #tpu.dot_dimension_numbers<[1], [0], [0], [1], [0, 0, 1, 1], [], []>} : vector<8x128xf32>, vector<128x16xf32>, vector<8x16xf32> -> vector<8x16xf32>
    %25 = vector.broadcast %0 : f32 to vector<8x16xf32>
    %26 = arith.mulf %25, %24 : vector<8x16xf32>
    %c0_19 = arith.constant 0 : index
    %c0_20 = arith.constant 0 : index
    %27 = vector.load %arg9[%c0_19, %c0_20] : memref<128x16xf32, #tpu.memory_space<vmem>>, vector<128x16xf32>
    %cst_21 = arith.constant dense<0.000000e+00> : vector<8x16xf32>
    %28 = tpu.matmul %22, %27, %cst_21 {dimension_numbers = #tpu.dot_dimension_numbers<[1], [0], [0], [1], [0, 0, 1, 1], [], []>} : vector<8x128xf32>, vector<128x16xf32>, vector<8x16xf32> -> vector<8x16xf32>
    %29 = vector.broadcast %0 : f32 to vector<8x16xf32>
    %30 = arith.mulf %29, %28 : vector<8x16xf32>
    %31 = math.cos %26 : vector<8x16xf32>
    %cst_22 = arith.constant dense<0.000000e+00> : vector<8xf32>
    %32 = vector.multi_reduction <add>, %31, %cst_22 [1] : vector<8x16xf32> to vector<8xf32>
    %33 = vector.shape_cast %32 : vector<8xf32> to vector<8x1xf32>
    %cst_23 = arith.constant 1.600000e+01 : f32
    %34 = vector.broadcast %cst_23 : f32 to vector<8x1xf32>
    %35 = arith.divf %33, %34 : vector<8x1xf32>
    %36 = math.sin %26 : vector<8x16xf32>
    %cst_24 = arith.constant dense<0.000000e+00> : vector<8xf32>
    %37 = vector.multi_reduction <add>, %36, %cst_24 [1] : vector<8x16xf32> to vector<8xf32>
    %38 = vector.shape_cast %37 : vector<8xf32> to vector<8x1xf32>
    %cst_25 = arith.constant 1.600000e+01 : f32
    %39 = vector.broadcast %cst_25 : f32 to vector<8x1xf32>
    %40 = arith.divf %38, %39 : vector<8x1xf32>
    %41 = math.cos %30 : vector<8x16xf32>
    %cst_26 = arith.constant dense<0.000000e+00> : vector<8xf32>
    %42 = vector.multi_reduction <add>, %41, %cst_26 [1] : vector<8x16xf32> to vector<8xf32>
    %43 = vector.shape_cast %42 : vector<8xf32> to vector<8x1xf32>
    %cst_27 = arith.constant 1.600000e+01 : f32
    %44 = vector.broadcast %cst_27 : f32 to vector<8x1xf32>
    %45 = arith.divf %43, %44 : vector<8x1xf32>
    %46 = math.sin %30 : vector<8x16xf32>
    %cst_28 = arith.constant dense<0.000000e+00> : vector<8xf32>
    %47 = vector.multi_reduction <add>, %46, %cst_28 [1] : vector<8x16xf32> to vector<8xf32>
    %48 = vector.shape_cast %47 : vector<8xf32> to vector<8x1xf32>
    %cst_29 = arith.constant 1.600000e+01 : f32
    %49 = vector.broadcast %cst_29 : f32 to vector<8x1xf32>
    %50 = arith.divf %48, %49 : vector<8x1xf32>
    %51 = arith.subf %35, %45 : vector<8x1xf32>
    %52 = arith.subf %40, %50 : vector<8x1xf32>
    %53 = arith.mulf %51, %51 : vector<8x1xf32>
    %54 = arith.mulf %52, %52 : vector<8x1xf32>
    %55 = arith.addf %53, %54 : vector<8x1xf32>
    %56 = vector.shape_cast %55 : vector<8x1xf32> to vector<1x8x1xf32>
    %cst_30 = arith.constant dense<0.000000e+00> : vector<1xf32>
    %57 = vector.multi_reduction <add>, %56, %cst_30 [1, 2] : vector<1x8x1xf32> to vector<1xf32>
    %58 = vector.shape_cast %57 : vector<1xf32> to vector<1x1x1xf32>
    %59 = vector.extract %58[0, 0, 0] : f32 from vector<1x1x1xf32>
    %cst_31 = arith.constant -1.250000e-01 : f32
    %60 = arith.mulf %cst_31, %59 : f32
    %c0_32 = arith.constant 0 : index
    %c0_33 = arith.constant 0 : index
    %61 = memref.load %arg10[%c0_32, %c0_33] : memref<1x1xf32, #tpu.memory_space<smem>>
    memref.store %60, %arg10[%c0_32, %c0_33] : memref<1x1xf32, #tpu.memory_space<smem>>
    return
  }
}

</mosaic_0001>

<bundles_post_ra>
// kernel: tpu_custom_call.1
= control target key start
LH: loop header
LB: loop body
LE: loop exit
PB: predicated region body
PF: predicated region fallthrough
CT: control target
= control target key end

     0   :  { %s1378_s0 = inlined_call_operand.<no memory space> [shape: f32[1], index: 0, kind: input, shape index: {}]   ;;  %s1379_s1 = inlined_call_operand.vmem [shape: f32[8,128], index: 1, kind: input, shape index: {}]   ;;  %s1380_s2 = inlined_call_operand.vmem [shape: f32[1,128], index: 2, kind: input, shape index: {}]   ;;  %s1381_s3 = inlined_call_operand.vmem [shape: f32[1,128], index: 3, kind: input, shape index: {}]   ;;  %s1382_s4 = inlined_call_operand.vmem [shape: f32[128,32], index: 4, kind: input, shape index: {}]   ;;  %s1383_s5 = inlined_call_operand.vmem [shape: f32[1,32], index: 5, kind: input, shape index: {}]   ;;  %s1384_s6 = inlined_call_operand.vmem [shape: f32[32,128], index: 6, kind: input, shape index: {}]   ;;  %s1385_s7 = inlined_call_operand.vmem [shape: f32[1,128], index: 7, kind: input, shape index: {}]   ;;  %s1386_s8 = inlined_call_operand.vmem [shape: f32[128,16], index: 8, kind: input, shape index: {}]   ;;  %s1387_s9 = inlined_call_operand.vmem [shape: f32[128,16], index: 9, kind: input, shape index: {}]   ;;  %s1388_s10 = inlined_call_operand.hbm [shape: f32[1,1], index: 10, kind: output, shape index: {}]  }
   0x1   :  { %v64_v0 = vld [vmem:[%s1382_s4 + $0x78] sm:$0xff]  ;;  %v63_v1 = vld [vmem:[%s1382_s4 + $0x70] sm:$0xff]  ;;  %v62_v2 = vld [vmem:[%s1382_s4 + $0x68] sm:$0xff] }
   0x2   :  { %69 = vmatpush.msra.mxu0 %v64_v0  ;;  %v61_v3 = vld [vmem:[%s1382_s4 + $0x60] sm:$0xff]  ;;  %v60_v4 = vld [vmem:[%s1382_s4 + $0x58] sm:$0xff]  ;;  %v59_v5 = vld [vmem:[%s1382_s4 + $0x50] sm:$0xff] }
   0x4   :  { %70 = vmatpush.msra.mxu0 %v63_v1 }
   0x6   :  { %71 = vmatpush.msra.mxu0 %v62_v2 }
   0x8   :  { %72 = vmatpush.msra.mxu0 %v61_v3 }
   0x9   :  { %16 = vsyncpa [#allocation4], 0  ;;  %v58_v6 = vld [vmem:[%s1382_s4 + $0x48] sm:$0xff]  ;;  %v57_v7 = vld [vmem:[%s1382_s4 + $0x40] sm:$0xff]  ;;  %vm116_vm3 = vcmask 261120   ;;  %s948_s30 = smov [#allocation3]  }
   0xa   :  { %73 = vmatpush.msra.mxu0 %v60_v4  ;;  %v56_v8 = vld [vmem:[%s1382_s4 + $0x38] sm:$0xff]  ;;  %v55_v9 = vld [vmem:[%s1382_s4 + $0x30] sm:$0xff]  ;;  %v54_v10 = vld [vmem:[%s1382_s4 + $0x28] sm:$0xff] }
   0xb   :  { %v53_v11 = vld [vmem:[%s1382_s4 + $0x20] sm:$0xff]  ;;  %v52_v14 = vld [vmem:[%s1382_s4 + $0x18] sm:$0xff]  ;;  %v51_v15 = vld [vmem:[%s1382_s4 + $0x10] sm:$0xff] }
   0xc   :  { %74 = vmatpush.msra.mxu0 %v59_v5  ;;  %v916_v12 = vld [vmem:[%s1381_s3] ss:$0 sm:$0xff]  ;;  %v50_v18 = vld [vmem:[%s1382_s4 + $0x8] sm:$0xff]  ;;  %v111_v21 = vld [vmem:[%s1384_s6 + $0x18] sm:$0xff] }
   0xd   :  { %v40_v13 = vld [vmem:[%s1379_s1] sm:$0xff]  ;;  %v110_v22 = vld [vmem:[%s1384_s6 + $0x10] sm:$0xff]  ;;  %132 = vmatpush.msra.mxu1 %v111_v21  ;;  %v109_v23 = vld [vmem:[%s1384_s6 + $0x8] sm:$0xff] }
   0xe   :  { %75 = vmatpush.msra.mxu0 %v58_v6  ;;  %v44_v16 = vmul.f32 %v916_v12, %v40_v13  ;;  %v917_v17 = vld [vmem:[%s1380_s2] ss:$0 sm:$0xff]  ;;  %v155_v26 = vld [vmem:[%s1386_s8 + $0x78] sm:$0xff]  ;;  %v154_v28 = vld [vmem:[%s1386_s8 + $0x70] sm:$0xff]  ;;  %v176_v12 = vstv %s1378_s0 }
   0xf   :  { %v49_v19 = vld [vmem:[%s1382_s4] sm:$0xff]  ;;  %133 = vmatpush.msra.mxu1 %v110_v22  ;;  %v193_v27 = vld [vmem:[%s1387_s9 + $0x78] sm:$0xff]  ;;  %156 = vmatpush.msra.mxu2 %v155_v26  ;;  %v192_v30 = vld [vmem:[%s1387_s9 + $0x70] sm:$0xff] }
  0x10   :  { %76 = vmatpush.msra.mxu0 %v57_v7  ;;  %v48_v20 = vadd.f32 %v917_v17, %v44_v16  ;;  %v108_v24 = vld [vmem:[%s1384_s6] sm:$0xff]  ;;  %194 = vmatpush.msra.mxu3 %v193_v27  ;;  %v153_v32 = vld [vmem:[%s1386_s8 + $0x68] sm:$0xff]  ;;  %v151_v37 = vld [vmem:[%s1386_s8 + $0x58] sm:$0xff] }
  0x11   :  { %134 = vmatpush.msra.mxu1 %v109_v23  ;;  %v918_v25 = vld [vmem:[%s1383_s5] ss:$0 sm:$0xff]  ;;  %v191_v33 = vld [vmem:[%s1387_s9 + $0x68] sm:$0xff]  ;;  %157 = vmatpush.msra.mxu2 %v154_v28  ;;  %v189_v38 = vld [vmem:[%s1387_s9 + $0x58] sm:$0xff] }
  0x12   :  { %77 = vmatpush.msra.mxu0 %v56_v8  ;;  %195 = vmatpush.msra.mxu3 %v192_v30  ;;  %v152_v35 = vld [vmem:[%s1386_s8 + $0x60] sm:$0xff]  ;;  %v150_v39 = vld [vmem:[%s1386_s8 + $0x50] sm:$0xff]  ;;  %v149_v41 = vld [vmem:[%s1386_s8 + $0x48] sm:$0xff] }
  0x13   :  { %135 = vmatpush.msra.mxu1 %v108_v24  ;;  %v190_v36 = vld [vmem:[%s1387_s9 + $0x60] sm:$0xff]  ;;  %158 = vmatpush.msra.mxu2 %v153_v32  ;;  %v188_v40 = vld [vmem:[%s1387_s9 + $0x50] sm:$0xff]  ;;  %v187_v42 = vld [vmem:[%s1387_s9 + $0x48] sm:$0xff] }
  0x14   :  { %78 = vmatpush.msra.mxu0 %v55_v9  ;;  %196 = vmatpush.msra.mxu3 %v191_v33  ;;  %v148_v44 = vld [vmem:[%s1386_s8 + $0x40] sm:$0xff]  ;;  %v147_v47 = vld [vmem:[%s1386_s8 + $0x38] sm:$0xff]  ;;  %v146_v49 = vld [vmem:[%s1386_s8 + $0x30] sm:$0xff] }
  0x15   :  { %159 = vmatpush.msra.mxu2 %v152_v35  ;;  %v186_v45 = vld [vmem:[%s1387_s9 + $0x40] sm:$0xff]  ;;  %v185_v48 = vld [vmem:[%s1387_s9 + $0x38] sm:$0xff]  ;;  %v184_v50 = vld [vmem:[%s1387_s9 + $0x30] sm:$0xff] }
  0x16   :  { %79 = vmatpush.msra.mxu0 %v54_v10  ;;  %197 = vmatpush.msra.mxu3 %v190_v36  ;;  %v145_v51 = vld [vmem:[%s1386_s8 + $0x28] sm:$0xff]  ;;  %v144_v53 = vld [vmem:[%s1386_s8 + $0x20] sm:$0xff]  ;;  %v143_v57 = vld [vmem:[%s1386_s8 + $0x18] sm:$0xff] }
  0x17   :  { %160 = vmatpush.msra.mxu2 %v151_v37  ;;  %v183_v52 = vld [vmem:[%s1387_s9 + $0x28] sm:$0xff]  ;;  %v182_v54 = vld [vmem:[%s1387_s9 + $0x20] sm:$0xff]  ;;  %v181_v58 = vld [vmem:[%s1387_s9 + $0x18] sm:$0xff] }
  0x18   :  { %80 = vmatpush.msra.mxu0 %v53_v11  ;;  %198 = vmatpush.msra.mxu3 %v189_v38  ;;  %v142_v60 = vld [vmem:[%s1386_s8 + $0x10] sm:$0xff]  ;;  %v141_v5 = vld [vmem:[%s1386_s8 + $0x8] sm:$0xff]  ;;  %v140_v7 = vld [vmem:[%s1386_s8] sm:$0xff]  ;;  %s881_s8 = sshll.u32 %s1388_s10, 4  ;;  %s882_s8 = int_to_ptr.hbm [resolvable:$true] %s881_s8 }
  0x19   :  { %161 = vmatpush.msra.mxu2 %v150_v39  ;;  %v180_v61 = vld [vmem:[%s1387_s9 + $0x10] sm:$0xff]  ;;  %v179_v6 = vld [vmem:[%s1387_s9 + $0x8] sm:$0xff]  ;;  %v178_v8 = vld [vmem:[%s1387_s9] sm:$0xff] }
  0x1a   :  { %81 = vmatpush.msra.mxu0 %v52_v14  ;;  %199 = vmatpush.msra.mxu3 %v188_v40  ;;  %v919_v9 = vld [vmem:[%s1385_s7] ss:$0 sm:$0xff] }
  0x1b   :  { %162 = vmatpush.msra.mxu2 %v149_v41 }
  0x1c   :  { %82 = vmatpush.msra.mxu0 %v51_v15  ;;  %200 = vmatpush.msra.mxu3 %v187_v42  ;;  %v940_v42 = vmov 920167782  }
  0x1d   :  { %163 = vmatpush.msra.mxu2 %v148_v44 }
  0x1e   :  { %83 = vmatpush.msra.mxu0 %v50_v18  ;;  %201 = vmatpush.msra.mxu3 %v186_v45  ;;  %v941_v45 = vmov 2102212464  }
  0x1f   :  { %164 = vmatpush.msra.mxu2 %v147_v47 }
  0x20   :  { %84 = vmatpush.msra.mxu0 %v49_v19  ;;  %202 = vmatpush.msra.mxu3 %v185_v48 }
  0x21   :  { %85 = vmatmul.f32.vlgmr.msra.gmra.mxu0 %v48_v20  ;;  %165 = vmatpush.msra.mxu2 %v146_v49  ;;  %v942_v49 = vmov 1326507024  }
  0x22   :  { %203 = vmatpush.msra.mxu3 %v184_v50 }
  0x23   :  { %166 = vmatpush.msra.mxu2 %v145_v51  ;;  %v943_v51 = vmov 683565275  }
  0x24   :  { %204 = vmatpush.msra.mxu3 %v183_v52 }
  0x25   :  { %167 = vmatpush.msra.mxu2 %v144_v53  ;;  %v944_v53 = vmov 2475754826  }
  0x26   :  { %205 = vmatpush.msra.mxu3 %v182_v54 }
  0x27   :  { %168 = vmatpush.msra.mxu2 %v143_v57  ;;  %v945_v57 = vmov 2131351028  }
  0x28   :  { %206 = vmatpush.msra.mxu3 %v181_v58 }
  0x29   :  { %169 = vmatpush.msra.mxu2 %v142_v60 }
  0x2a   :  { %207 = vmatpush.msra.mxu3 %v180_v61 }
  0x2b   :  { %170 = vmatpush.msra.mxu2 %v141_v5 }
  0x2c   :  { %208 = vmatpush.msra.mxu3 %v179_v6 }
  0x2d   :  { %171 = vmatpush.msra.mxu2 %v140_v7 }
  0x2e   :  { %209 = vmatpush.msra.mxu3 %v178_v8 }
  0x9e   :  { %v86_v29 = vpop.f32.mrf.mxu0 }
  0x9f   :  { %v87_v31 = vadd.f32 %v918_v25, %v86_v29 }
  0xa1   :  { %v891_v34 = vmul.f32 -1.442695, %v87_v31 }
  0xa3   :  { %920 = vpow2.f32 %v891_v34 }
  0xa9   :  { %v921_v43 = vpop.eup %920 }
  0xaa   :  { %v92_v46 = vadd.f32 1.0, %v921_v43 }
  0xac   :  { %922 = vrcp.f32 %v92_v46  ;;  %v104_v62 = vand.u32 2147483648, %v92_v46  ;;  %v102_v0 = vand.u32 2147483647, %v92_v46  ;;  %vm98_vm1 = vweird.f32 %v92_v46 }
  0xae   :  { %v105_v2 = vor.u32 1.1754944e-38, %v104_v62  ;;  %vm103_vm4 = vcmp.eq.f32.partialorder %v102_v0, 8.507059e+37 }
  0xb2   :  { %v923_v55 = vpop.eup %922 }
  0xb3   :  { %v94_v56 = vmul.f32 %v923_v55, %v92_v46  ;;  %vm99_vm0 = vweird.f32 %v923_v55 }
  0xb4   :  { %vm100_vm2 = vmor %vm98_vm1, %vm99_vm0 }
  0xb5   :  { %v95_v59 = vsub.f32 1.0, %v94_v56 }
  0xb7   :  { %v96_v63 = vmul.f32 %v923_v55, %v95_v59 }
  0xb9   :  { %v97_v1 = vadd.f32 %v923_v55, %v96_v63 }
  0xbb   :  { %v101_v3 = vsel %vm100_vm2, %v923_v55, %v97_v1 }
  0xbc   :  { %v106_v4 = vsel %vm103_vm4, %v105_v2, %v101_v3 }
  0xbd   :  { %892 = vmatmul.msk.f32.vlgmr.msra.gmra.mxu1 %vm116_vm3, %v106_v4 }
 0x13a   :  { %v137_v10 = vpop.f32.mrf.mxu1 }
 0x13b   :  { %v138_v11 = vadd.f32 %v919_v9, %v137_v10 }
 0x13d   :  { %172 = vmatmul.f32.vlgmr.msra.gmra.mxu2 %v138_v11  ;;  %210 = vmatmul.f32.vlgmr.msra.gmra.mxu3 %v138_v11 }
 0x1c0   :  { %v173_v13 = vpop.f32.mrf.mxu2  ;;  %v211_v14 = vpop.f32.mrf.mxu3 }
 0x1c1   :  { %v1178_v15 = vmul.f32 %v176_v12, %v173_v13  ;;  %v1180_v16 = vmul.f32 %v211_v14, %v176_v12 }
 0x1c3   :  { %v218_v17 = vand.u32 2139095040, %v1178_v15  ;;  %v543_v18 = vand.u32 2139095040, %v1180_v16  ;;  %v540_v19 = vand.u32 2147483647, %v1180_v16  ;;  %v215_v20 = vand.u32 2147483647, %v1178_v15 }
 0x1c5   :  { %v219_v21 = vshrl.u32 %v218_v17, 23  ;;  %v544_v22 = vshrl.u32 %v543_v18, 23  ;;  %v547_v23 = vand.u32 8388607, %v540_v19  ;;  %v222_v26 = vand.u32 8388607, %v215_v20 }
 0x1c7   :  { %v893_v24 = vadd.s32 4294967169, %v219_v21  ;;  %v899_v25 = vadd.s32 4294967169, %v544_v22  ;;  %v548_v27 = vor.u32 8388608, %v547_v23  ;;  %v223_v30 = vor.u32 8388608, %v222_v26 }
 0x1c9   :  { %v225_v28 = vadd.s32 1, %v893_v24  ;;  %v550_v29 = vadd.s32 1, %v899_v25  ;;  %v1190_v33 = vshll.u32 %v548_v27, 8  ;;  %v1197_v37 = vshll.u32 %v223_v30, 8 }
 0x1cb   :  { %vm226_vm5 = vcmp.gt.s32.totalorder %v225_v28, 0  ;;  %vm551_vm6 = vcmp.gt.s32.totalorder %v550_v29, 0  ;;  %v1202_v40 = vand.u32 65535, %v1190_v33  ;;  %v1205_v41 = vshrl.u32 %v1190_v33, 16 }
 0x1cc   :  { %v227_v31 = vsel %vm226_vm5, %v225_v28, 0  ;;  %v552_v32 = vsel %vm551_vm6, %v550_v29, 0 }
 0x1cd   :  { %v1192_v34 = vand.u32 31, %v227_v31  ;;  %v554_v35 = vand.u32 31, %v552_v32  ;;  %v1199_v38 = vshrl.u32 %v227_v31, 5  ;;  %v1208_v44 = vshrl.u32 %v552_v32, 5 }
 0x1cf   :  { %v1195_v36 = vsub.s32 32, %v1192_v34  ;;  %v555_v39 = vsub.s32 32, %v554_v35  ;;  %v566_v46 = vshll.u32 %v941_v45, %v554_v35  ;;  %v569_v47 = vshll.u32 %v940_v42, %v554_v35 }
 0x1d0   :  { %v557_v52 = vshll.u32 %v943_v51, %v554_v35  ;;  %v560_v56 = vshll.u32 %v944_v53, %v554_v35  ;;  %v563_v59 = vshll.u32 %v945_v57, %v554_v35  ;;  %v241_v0 = vshll.u32 %v941_v45, %v1192_v34 }
 0x1d1   :  { %v242_v43 = vshrl.u32 %v940_v42, %v1195_v36  ;;  %v567_v48 = vshrl.u32 %v940_v42, %v555_v39  ;;  %v570_v50 = vshrl.u32 %v942_v49, %v555_v39  ;;  %v558_v54 = vshrl.u32 %v944_v53, %v555_v39 }
 0x1d2   :  { %v245_v55 = vshrl.u32 %v942_v49, %v1195_v36  ;;  %v561_v58 = vshrl.u32 %v945_v57, %v555_v39  ;;  %v564_v63 = vshrl.u32 %v941_v45, %v555_v39  ;;  %v244_v1 = vshll.u32 %v940_v42, %v1192_v34 }
 0x1d3   :  { %v568_v60 = vor.u32 %v567_v48, %v566_v46  ;;  %v571_v61 = vor.u32 %v570_v50, %v569_v47  ;;  %v559_v62 = vor.u32 %v558_v54, %v557_v52  ;;  %vm575_vm7 = vcmp.lt.s32.totalorder %v1208_v44, 4 }
 0x1d4   :  { %v562_v2 = vor.u32 %v561_v58, %v560_v56  ;;  %v565_v5 = vor.u32 %v564_v63, %v563_v59  ;;  %vm572_vm8 = vcmp.lt.s32.totalorder %v1208_v44, 1  ;;  %v1221_v6 = vor.u32 %v242_v43, %v241_v0 }
 0x1d5   :  { %v581_v3 = vsel %vm575_vm7, %v568_v60, 920167782  ;;  %v585_v4 = vsel %vm575_vm7, %v571_v61, 1326507024  ;;  %v246_v7 = vor.u32 %v245_v55, %v244_v1  ;;  %vm574_vm9 = vcmp.lt.s32.totalorder %v1208_v44, 3 }
 0x1d6   :  { %v580_v8 = vsel %vm572_vm8, %v559_v62, %v562_v2  ;;  %vm573_vm10 = vcmp.lt.s32.totalorder %v1208_v44, 2  ;;  %v582_v9 = vsel %vm574_vm9, %v565_v5, %v581_v3  ;;  %v584_v10 = vsel %vm572_vm8, %v562_v2, %v565_v5 }
 0x1d7   :  { %v586_v11 = vsel %vm574_vm9, %v568_v60, %v585_v4  ;;  %v556_v12 = vshrl.u32 %v943_v51, %v555_v39  ;;  %v577_v13 = vsel %vm575_vm7, %v565_v5, 2102212464  ;;  %v583_v14 = vsel %vm573_vm10, %v580_v8, %v582_v9 }
 0x1d8   :  { %v587_v17 = vsel %vm573_vm10, %v584_v10, %v586_v11  ;;  %vm250_vm11 = vcmp.lt.s32.totalorder %v1199_v38, 4  ;;  %v613_v22 = vand.u32 65535, %v583_v14  ;;  %v614_v26 = vshrl.u32 %v583_v14, 16 }
 0x1d9   :  { %v591_v18 = vand.u32 65535, %v587_v17  ;;  %v592_v21 = vshrl.u32 %v587_v17, 16  ;;  %v256_v23 = vsel %vm250_vm11, %v1221_v6, 920167782  ;;  %v260_v24 = vsel %vm250_vm11, %v246_v7, 1326507024 }
 0x1da   :  { %v576_v25 = vsel %vm572_vm8, %v556_v12, %v559_v62  ;;  %v578_v27 = vsel %vm574_vm9, %v562_v2, %v577_v13  ;;  %v232_v30 = vshll.u32 %v943_v51, %v1192_v34  ;;  %v616_v31 = vmul.u32 %v614_v26, %v1202_v40 }
 0x1db   :  { %v594_v28 = vmul.u32 %v592_v21, %v1202_v40  ;;  %v595_v29 = vmul.u32 %v591_v18, %v1205_v41  ;;  %v617_v32 = vmul.u32 %v613_v22, %v1205_v41  ;;  %v233_v35 = vshrl.u32 %v944_v53, %v1195_v36 }
 0x1dc   :  { %v235_v39 = vshll.u32 %v944_v53, %v1192_v34  ;;  %v593_v42 = vmul.u32 %v591_v18, %v1202_v40  ;;  %v596_v43 = vmul.u32 %v592_v21, %v1205_v41  ;;  %v615_v47 = vmul.u32 %v613_v22, %v1202_v40 }
 0x1dd   :  { %v597_v46 = vshll.u32 %v594_v28, 16  ;;  %v598_v48 = vshrl.u32 %v594_v28, 16  ;;  %v599_v49 = vshll.u32 %v595_v29, 16  ;;  %v618_v50 = vmul.u32 %v614_v26, %v1205_v41 }
 0x1de   :  { %v619_v52 = vshll.u32 %v616_v31, 16  ;;  %v621_v55 = vshll.u32 %v617_v32, 16  ;;  %v236_v56 = vshrl.u32 %v945_v57, %v1195_v36  ;;  %v946_v58 = vmov 0  }
 0x1df   :  { %vm601_vm12 = vc.u32 %v593_v42, %v597_v46  ;;  %v603_v54 = vadd.s32 %v597_v46, %v593_v42  ;;  %v1263_v60 = vor.u32 %v233_v35, %v232_v30  ;;  %v600_v41 = vshrl.u32 %v595_v29, 16 }
 0x1e0   :  { %v602_v53 = vsel %vm601_vm12, 1, %v946_v58  ;;  %vm623_vm13 = vc.u32 %v615_v47, %v619_v52  ;;  %v625_v59 = vadd.s32 %v619_v52, %v615_v47  ;;  %v1266_v62 = vor.u32 %v236_v56, %v235_v39 }
 0x1e1   :  { %v604_v61 = vadd.s32 %v602_v53, %v596_v43  ;;  %vm605_vm14 = vc.u32 %v603_v54, %v599_v49  ;;  %v624_v40 = vsel %vm623_vm13, 1, %v946_v58  ;;  %v238_v3 = vshll.u32 %v945_v57, %v1192_v34 }
 0x1e2   :  { %v606_v63 = vsel %vm605_vm14, 1, %v946_v58  ;;  %v626_v0 = vadd.s32 %v624_v40, %v618_v50  ;;  %vm627_vm15 = vc.u32 %v625_v59, %v621_v55  ;;  %v239_v4 = vshrl.u32 %v941_v45, %v1195_v36 }
 0x1e3   :  { %v608_v1 = vadd.s32 %v606_v63, %v604_v61  ;;  %v628_v2 = vsel %vm627_vm15, 1, %v946_v58  ;;  %v620_v5 = vshrl.u32 %v616_v31, 16  ;;  %vm247_vm0 = vcmp.lt.s32.totalorder %v1199_v38, 1 }
 0x1e4   :  { %v630_v7 = vadd.s32 %v628_v2, %v626_v0  ;;  %vm249_vm1 = vcmp.lt.s32.totalorder %v1199_v38, 3  ;;  %v240_v9 = vor.u32 %v239_v4, %v238_v3  ;;  %v255_v10 = vsel %vm247_vm0, %v1263_v60, %v1266_v62 }
 0x1e5   :  { %v609_v8 = vadd.s32 %v608_v1, %v598_v48  ;;  %v261_v34 = vsel %vm249_vm1, %v1221_v6, %v260_v24  ;;  %v622_v57 = vshrl.u32 %v617_v32, 16  ;;  %v1283_v11 = vadd.s32 %v625_v59, %v621_v55 }
 0x1e6   :  { %v631_v45 = vadd.s32 %v630_v7, %v620_v5  ;;  %vm248_vm2 = vcmp.lt.s32.totalorder %v1199_v38, 2  ;;  %v257_v13 = vsel %vm249_vm1, %v240_v9, %v256_v23  ;;  %v259_v14 = vsel %vm247_vm0, %v1266_v62, %v240_v9 }
 0x1e7   :  { %v1285_v12 = vadd.s32 %v609_v8, %v600_v41  ;;  %v579_v17 = vsel %vm573_vm10, %v576_v25, %v578_v27  ;;  %v258_v6 = vsel %vm248_vm2, %v255_v10, %v257_v13  ;;  %v262_v21 = vsel %vm248_vm2, %v259_v14, %v261_v34 }
 0x1e8   :  { %v632_v18 = vadd.s32 %v631_v45, %v622_v57  ;;  %v264_v22 = vand.u32 65535, %v1197_v37  ;;  %v265_v23 = vshrl.u32 %v1197_v37, 16  ;;  %v266_v24 = vand.u32 65535, %v262_v21 }
 0x1e9   :  { %vm635_vm3 = vc.u32 %v1285_v12, %v1283_v11  ;;  %v267_v28 = vshrl.u32 %v262_v21, 16  ;;  %v288_v29 = vand.u32 65535, %v258_v6  ;;  %v289_v44 = vshrl.u32 %v258_v6, 16 }
 0x1ea   :  { %v636_v26 = vadd.s32 1, %v632_v18  ;;  %v633_v25 = vmul.u32 %v1190_v33, %v579_v17  ;;  %v270_v31 = vmul.u32 %v266_v24, %v265_v23  ;;  %v268_v39 = vmul.u32 %v266_v24, %v264_v22 }
 0x1eb   :  { %v269_v30 = vmul.u32 %v267_v28, %v264_v22  ;;  %v291_v35 = vmul.u32 %v289_v44, %v264_v22  ;;  %v292_v43 = vmul.u32 %v288_v29, %v265_v23  ;;  %v271_v47 = vmul.u32 %v267_v28, %v265_v23 }
 0x1ec   :  { %v637_v27 = vsel %vm635_vm3, %v636_v26, %v632_v18  ;;  %v290_v48 = vmul.u32 %v288_v29, %v264_v22  ;;  %v274_v50 = vshll.u32 %v270_v31, 16  ;;  %v293_v54 = vmul.u32 %v289_v44, %v265_v23 }
 0x1ed   :  { %v638_v32 = vadd.s32 %v637_v27, %v633_v25  ;;  %v272_v42 = vshll.u32 %v269_v30, 16  ;;  %v294_v49 = vshll.u32 %v291_v35, 16  ;;  %v296_v59 = vshll.u32 %v292_v43, 16 }
 0x1ee   :  { %v252_v0 = vsel %vm250_vm11, %v240_v9, 2102212464  ;;  %v273_v1 = vshrl.u32 %v269_v30, 16  ;;  %v231_v4 = vshrl.u32 %v943_v51, %v1195_v36  ;;  %v275_v7 = vshrl.u32 %v270_v31, 16 }
 0x1ef   :  { %v639_v46 = vadd.s32 536870912, %v638_v32  ;;  %vm276_vm4 = vc.u32 %v268_v39, %v272_v42  ;;  %v278_v52 = vadd.s32 %v272_v42, %v268_v39  ;;  %vm298_vm5 = vc.u32 %v290_v48, %v294_v49 }
 0x1f0   :  { %v277_v33 = vsel %vm276_vm4, 1, %v946_v58  ;;  %v300_v56 = vadd.s32 %v294_v49, %v290_v48  ;;  %v299_v61 = vsel %vm298_vm5, 1, %v946_v58  ;;  %v295_v10 = vshrl.u32 %v291_v35, 16 }
 0x1f1   :  { %v1304_v55 = vshrl.u32 %v639_v46, 30  ;;  %v279_v53 = vadd.s32 %v277_v33, %v271_v47  ;;  %vm280_vm6 = vc.u32 %v278_v52, %v274_v50  ;;  %v301_v63 = vadd.s32 %v299_v61, %v293_v54 }
 0x1f2   :  { %v281_v41 = vsel %vm280_vm6, 1, %v946_v58  ;;  %vm302_vm7 = vc.u32 %v300_v56, %v296_v59  ;;  %v251_v45 = vsel %vm247_vm0, %v231_v4, %v1263_v60  ;;  %v253_v9 = vsel %vm249_vm1, %v1266_v62, %v252_v0 }
 0x1f3   :  { %v641_v40 = vshll.u32 %v1304_v55, 30  ;;  %v283_v2 = vadd.s32 %v281_v41, %v279_v53  ;;  %v303_v5 = vsel %vm302_vm7, 1, %v946_v58  ;;  %v297_v14 = vshrl.u32 %v292_v43, 16 }
 0x1f4   :  { %v305_v34 = vadd.s32 %v303_v5, %v301_v63  ;;  %v304_v51 = vadd.s32 %v300_v56, %v296_v59  ;;  %v254_v18 = vsel %vm248_vm2, %v251_v45, %v253_v9  ;;  %v634_v62 = vadd.s32 %v1283_v11, %v1285_v12 }
 0x1f5   :  { %v642_v3 = vsub.s32 %v638_v32, %v641_v40  ;;  %v284_v8 = vadd.s32 %v283_v2, %v273_v1  ;;  %v308_v23 = vmul.u32 %v1197_v37, %v254_v18  ;;  %vm542_vm12 = vcmp.lt.s32.totalorder %v1180_v16, 0 }
 0x1f6   :  { %v306_v17 = vadd.s32 %v305_v34, %v295_v10  ;;  %vm1332_vm13 = vcmp.le.f32.partialorder %v540_v19, 0.7853982  ;;  %v664_v56 = vsub.s32 4, %v1304_v55  ;;  %vm369_vm15 = vcmask 130048  }
 0x1f7   :  { %vm643_vm8 = vcmp.lt.s32.totalorder %v642_v3, 0  ;;  %v644_v57 = vsub.s32 0, %v642_v3  ;;  %v285_v13 = vadd.s32 %v284_v8, %v275_v7  ;;  %vm217_vm0 = vcmp.lt.s32.totalorder %v1178_v15, 0 }
 0x1f8   :  { %v307_v6 = vadd.s32 %v306_v17, %v297_v14  ;;  %v665_v2 = vsel %vm542_vm12, %v664_v56, %v1304_v55  ;;  %vm1350_vm3 = vcmp.le.f32.partialorder %v215_v20, 0.7853982  ;;  %vm683_vm5 = vweird.f32 %v1180_v16 }
 0x1f9   :  { %v645_v36 = vsel %vm643_vm8, %v644_v57, %v642_v3  ;;  %vm310_vm9 = vc.u32 %v285_v13, %v304_v51  ;;  %v309_v40 = vadd.s32 %v304_v51, %v285_v13  ;;  %v667_v34 = vsel %vm1332_vm13, 0, %v665_v2 }
 0x1fa   :  { %v646_v58 = vclz %v645_v36  ;;  %v311_v22 = vadd.s32 1, %v307_v6  ;;  %v842_v51 = vadd.s32 3, %v667_v34  ;;  %v684_v55 = vand.u32 3, %v667_v34 }
 0x1fb   :  { %v947_v34 = vmov 16.0  }
 0x1fc   :  { %v900_v21 = vadd.s32 4294967294, %v646_v58  ;;  %v312_v60 = vsel %vm310_vm9, %v311_v22, %v307_v6  ;;  %vm686_vm1 = vcmp.eq.s32.totalorder %v684_v55, 0  ;;  %vm689_vm2 = vcmp.eq.s32.totalorder %v684_v55, 2 }
 0x1fd   :  { %v313_v26 = vadd.s32 %v312_v60, %v308_v23  ;;  %v843_v60 = vand.u32 3, %v842_v51  ;;  %vm685_vm4 = vcmp.lt.s32.totalorder %v684_v55, 2  ;;  %924 = vrcp.f32 %v947_v34 }
 0x1fe   :  { %vm901_vm10 = vcmp.lt.s32.totalorder %v900_v21, 0 }
 0x1ff   :  { %v649_v24 = vsel %vm901_vm10, 0, %v900_v21  ;;  %v314_v44 = vadd.s32 536870912, %v313_v26  ;;  %vm845_vm6 = vcmp.eq.s32.totalorder %v843_v60, 0  ;;  %vm848_vm7 = vcmp.eq.s32.totalorder %v843_v60, 2 }
 0x200   :  { %v650_v28 = vsub.s32 32, %v649_v24  ;;  %v654_v29 = vsub.s32 4294967266, %v649_v24  ;;  %v651_v25 = vshll.u32 %v642_v3, %v649_v24  ;;  %vm844_vm8 = vcmp.lt.s32.totalorder %v843_v60, 2 }
 0x201   :  { %v1326_v30 = vshrl.u32 %v314_v44, 30 }
 0x202   :  { %v652_v27 = vshrl.u32 %v634_v62, %v650_v28  ;;  %v655_v38 = vadd.s32 127, %v654_v29 }
 0x203   :  { %v316_v35 = vshll.u32 %v1326_v30, 30 }
 0x204   :  { %v653_v31 = vor.u32 %v652_v27, %v651_v25  ;;  %v656_v32 = vshll.u32 %v655_v38, 23  ;;  %v339_v38 = vsub.s32 4, %v1326_v30 }
 0x205   :  { %v317_v39 = vsub.s32 %v313_v26, %v316_v35 }
 0x206   :  { %v657_v37 = vor.u32 4788187, %v656_v32  ;;  %v660_v43 = vcvt.s32.f32 %v653_v31 }
 0x207   :  { %vm318_vm11 = vcmp.lt.s32.totalorder %v317_v39, 0  ;;  %v319_v46 = vsub.s32 0, %v317_v39 }
 0x208   :  { %v658_v42 = vand.u32 2147483647, %v657_v37 }
 0x209   :  { %v320_v11 = vsel %vm318_vm11, %v319_v46, %v317_v39 }
 0x20a   :  { %v661_v47 = vmul.f32 %v660_v43, %v658_v42  ;;  %v321_v48 = vclz %v320_v11 }
 0x20c   :  { %v662_v12 = vxor.u32 2147483648, %v661_v47  ;;  %v894_v52 = vadd.s32 4294967294, %v321_v48 }
 0x20e   :  { %v663_v50 = vsel %vm542_vm12, %v662_v12, %v661_v47  ;;  %vm895_vm14 = vcmp.lt.s32.totalorder %v894_v52, 0  ;;  %v340_v47 = vsel %vm217_vm0, %v339_v38, %v1326_v30  ;;  %vm358_vm12 = vweird.f32 %v1178_v15 }
 0x20f   :  { %v666_v54 = vsel %vm1332_vm13, %v1180_v16, %v663_v50  ;;  %v324_v53 = vsel %vm895_vm14, 0, %v894_v52  ;;  %v342_v49 = vsel %vm1350_vm3, 0, %v340_v47 }
 0x210   :  { %v668_v33 = vmul.f32 %v666_v54, %v666_v54  ;;  %v325_v19 = vsub.s32 32, %v324_v53  ;;  %v329_v41 = vsub.s32 4294967266, %v324_v53  ;;  %v326_v3 = vshll.u32 %v317_v39, %v324_v53 }
 0x211   :  { %v525_v53 = vadd.s32 3, %v342_v49 }
 0x212   :  { %v669_v59 = vmul.f32 -0.001358992, %v668_v33  ;;  %v676_v61 = vmul.f32 -0.00019511016, %v668_v33  ;;  %v327_v1 = vshrl.u32 %v309_v40, %v325_v19  ;;  %v330_v4 = vadd.s32 127, %v329_v41 }
 0x213   :  { %v359_v40 = vand.u32 3, %v342_v49  ;;  %v526_v41 = vand.u32 3, %v525_v53 }
 0x214   :  { %v670_v63 = vadd.f32 0.041655596, %v669_v59  ;;  %v677_v0 = vadd.f32 0.008332121, %v676_v61  ;;  %v328_v8 = vor.u32 %v327_v1, %v326_v3  ;;  %v331_v10 = vshll.u32 %v330_v4, 23 }
 0x215   :  { %vm361_vm9 = vcmp.eq.s32.totalorder %v359_v40, 0  ;;  %vm364_vm10 = vcmp.eq.s32.totalorder %v359_v40, 2  ;;  %vm360_vm11 = vcmp.lt.s32.totalorder %v359_v40, 2  ;;  %vm528_vm13 = vcmp.eq.s32.totalorder %v526_v41, 0 }
 0x216   :  { %v671_v5 = vmul.f32 %v670_v63, %v668_v33  ;;  %v678_v7 = vmul.f32 %v677_v0, %v668_v33  ;;  %v332_v9 = vor.u32 4788187, %v331_v10  ;;  %v335_v36 = vcvt.s32.f32 %v328_v8 }
 0x217   :  { %vm531_vm14 = vcmp.eq.s32.totalorder %v526_v41, 2 }
 0x218   :  { %v672_v57 = vadd.f32 -0.4999988, %v671_v5  ;;  %v679_v45 = vadd.f32 -0.16666654, %v678_v7  ;;  %v333_v17 = vand.u32 2147483647, %v332_v9 }
 0x21a   :  { %v673_v13 = vmul.f32 %v672_v57, %v668_v33  ;;  %v680_v14 = vmul.f32 %v679_v45, %v668_v33  ;;  %v336_v6 = vmul.f32 %v335_v36, %v333_v17  ;;  %v925_v57 = vpop.eup %924 }
 0x21b   :  { %v374_v45 = vmul.f32 16.0, %v925_v57 }
 0x21c   :  { %v674_v58 = vadd.f32 1.0, %v673_v13  ;;  %v681_v18 = vadd.f32 1.0, %v680_v14  ;;  %v337_v23 = vxor.u32 2147483648, %v336_v6 }
 0x21e   :  { %v682_v21 = vmul.f32 %v681_v18, %v666_v54  ;;  %v690_v22 = vxor.u32 2147483648, %v674_v58  ;;  %v338_v62 = vsel %vm217_vm0, %v337_v23, %v336_v6  ;;  %vm527_vm0 = vcmp.lt.s32.totalorder %v526_v41, 2 }
 0x21f   :  { %v341_v44 = vsel %vm1350_vm3, %v1178_v15, %v338_v62  ;;  %v375_v15 = vsub.f32 1.0, %v374_v45 }
 0x220   :  { %v687_v24 = vxor.u32 2147483648, %v682_v21  ;;  %v691_v29 = vsel %vm689_vm2, %v690_v22, %v682_v21  ;;  %v343_v27 = vmul.f32 %v341_v44, %v341_v44  ;;  %v850_v39 = vsel %vm848_vm7, %v690_v22, %v682_v21 }
 0x221   :  { %v376_v9 = vmul.f32 %v925_v57, %v375_v15 }
 0x222   :  { %v688_v28 = vsel %vm686_vm1, %v674_v58, %v687_v24  ;;  %v847_v31 = vsel %vm845_vm6, %v674_v58, %v687_v24  ;;  %v344_v35 = vmul.f32 -0.001358992, %v343_v27  ;;  %v351_v37 = vmul.f32 -0.00019511016, %v343_v27 }
 0x223   :  { %v692_v25 = vsel %vm685_vm4, %v688_v28, %v691_v29  ;;  %v851_v46 = vsel %vm844_vm8, %v847_v31, %v850_v39  ;;  %v377_v14 = vadd.f32 %v925_v57, %v376_v9  ;;  %vm378_vm1 = vweird.f32 %v925_v57 }
 0x224   :  { %v693_v20 = vsel %vm683_vm5, nan, %v692_v25  ;;  %v345_v42 = vadd.f32 0.041655596, %v344_v35  ;;  %v352_v43 = vadd.f32 0.008332121, %v351_v37  ;;  %v852_v48 = vsel %vm683_vm5, nan, %v851_v46 }
 0x225   :  { %v694_v32 = vsel %vm369_vm15, %v693_v20, 0.0  ;;  %v853_v56 = vsel %vm369_vm15, %v852_v48, 0.0  ;;  %v379_v36 = vsel %vm378_vm1, %v925_v57, %v377_v14 }
 0x226   :  { %695 = vadd.xlane.f32.xlu1 %v694_v32  ;;  %v346_v11 = vmul.f32 %v345_v42, %v343_v27  ;;  %v353_v12 = vmul.f32 %v352_v43, %v343_v27 }
 0x228   :  { %v347_v50 = vadd.f32 -0.4999988, %v346_v11  ;;  %v354_v52 = vadd.f32 -0.16666654, %v353_v12 }
 0x22a   :  { %v348_v54 = vmul.f32 %v347_v50, %v343_v27  ;;  %v355_v33 = vmul.f32 %v354_v52, %v343_v27 }
 0x22c   :  { %v349_v59 = vadd.f32 1.0, %v348_v54  ;;  %v356_v61 = vadd.f32 1.0, %v355_v33 }
 0x22e   :  { %854 = vadd.xlane.f32.xlu1 %v853_v56  ;;  %v357_v30 = vmul.f32 %v356_v61, %v341_v44  ;;  %v365_v19 = vxor.u32 2147483648, %v349_v59 }
 0x230   :  { %v362_v63 = vxor.u32 2147483648, %v357_v30  ;;  %v366_v0 = vsel %vm364_vm10, %v365_v19, %v357_v30  ;;  %v533_v5 = vsel %vm531_vm14, %v365_v19, %v357_v30 }
 0x232   :  { %v363_v16 = vsel %vm361_vm9, %v349_v59, %v362_v63  ;;  %v530_v3 = vsel %vm528_vm13, %v349_v59, %v362_v63 }
 0x233   :  { %v367_v1 = vsel %vm360_vm11, %v363_v16, %v366_v0  ;;  %v534_v7 = vsel %vm527_vm0, %v530_v3, %v533_v5 }
 0x234   :  { %v368_v2 = vsel %vm358_vm12, nan, %v367_v1  ;;  %v535_v8 = vsel %vm358_vm12, nan, %v534_v7 }
 0x235   :  { %v370_v4 = vsel %vm369_vm15, %v368_v2, 0.0  ;;  %v536_v10 = vsel %vm369_vm15, %v535_v8, 0.0  ;;  %vm862_vm15 = vcmask 7168  }
 0x236   :  { %371 = vadd.xlane.f32.xlu0 %v370_v4 }
 0x23e   :  { %537 = vadd.xlane.f32.xlu0 %v536_v10 }
 0x299   :  { %v696_v13 = vpop.xlane.xlu1 %695 }
 0x29a   :  { %v697_v58 = vmul.f32 %v696_v13, %v379_v36 }
 0x2a1   :  { %v855_v51 = vpop.xlane.xlu1 %854 }
 0x2a2   :  { %v856_v55 = vmul.f32 %v855_v51, %v379_v36 }
 0x2a9   :  { %v372_v17 = vpop.xlane.xlu0 %371 }
 0x2aa   :  { %v380_v18 = vmul.f32 %v379_v36, %v372_v17 }
 0x2ac   :  { %v857_v21 = vsub.f32 %v380_v18, %v697_v58 }
 0x2ae   :  { %v859_v60 = vmul.f32 %v857_v21, %v857_v21 }
 0x2b1   :  { %v538_v6 = vpop.xlane.xlu0 %537 }
 0x2b2   :  { %v539_v22 = vmul.f32 %v538_v6, %v379_v36 }
 0x2b4   :  { %v858_v23 = vsub.f32 %v539_v22, %v856_v55 }
 0x2b6   :  { %v860_v24 = vmul.f32 %v858_v23, %v858_v23 }
 0x2b8   :  { %v861_v26 = vadd.f32 %v860_v24, %v859_v60 }
 0x2ba   :  { %v863_v62 = vsel %vm862_vm15, %v861_v26, 0.0 }
 0x2bb   :  { %864 = vadd.xlane.f32.xlu2 %v863_v62 }
 0x32e   :  { %v865_v28 = vpop.xlane.xlu2 %864 }
 0x32f   :  { %v866_v29 = vrot.slane %v865_v28, 4 }
 0x331   :  { %v867_v44 = vadd.f32 %v866_v29, %v865_v28 }
 0x333   :  { %v868_v25 = vrot.slane %v867_v44, 2 }
 0x335   :  { %v869_v27 = vadd.f32 %v868_v25, %v867_v44 }
 0x337   :  { %v870_v20 = vrot.slane %v869_v27, 1 }
 0x339   :  { %v871_v38 = vadd.f32 %v870_v20, %v869_v27 }
 0x33b   :  { %905 = vpush %v871_v38 }
 0x36c   :  { %s906_s9 = spop %905 }
 0x36d   :  { %s873_s29 = smul.f32 -0.125, %s906_s9 }
 0x36f   :  { %875 = sst [smem:[#allocation3]] %s873_s29 }
 0x370   :  { %884 = dma.smem_to_hbm %s948_s30, 16, %s882_s8, [#allocation4]  }
 0x371   :  { %938 = dma.done.wait [#allocation4], 16  }
 0x372   :  { %939 = vsyncadd [#allocation4], 4294967280 }
 0x373   :  { %889 = sfence }
 0x374   :  { %890 = vsyncpa [#allocation4], 1 }

</bundles_post_ra>
